<compile_context>
chip_gen: v6e
topology: v6e:2x2x1
jax: 0.10.0
libtpu: 0.0.40
codegen_flags: <defaults>
</compile_context>

<pallas_src>
import jax
import jax.numpy as jnp
from jax.experimental import pallas as pl
from jax.experimental.pallas import tpu as pltpu

LANE = 128  # TPU lane width


def _round_up(n, m):
    return ((n + m - 1) // m) * m


def ffnn_kernel(x_ref, w1_ref, b1_ref, w2_ref, b2_ref, w3_ref, b3_ref, out_ref):
    # x is already bf16 (cast + padded in the wrapper); weights are bf16;
    # biases are f32. All matmuls accumulate in f32 on the MXU.
    x = x_ref[...]

    # Layer 1: Linear + ReLU   (Dropout = identity at eval)
    h1 = jnp.dot(x, w1_ref[...], preferred_element_type=jnp.float32) + b1_ref[...]
    h1 = jnp.maximum(h1, 0.0)

    # Layer 2: Linear + ReLU   (Dropout = identity at eval)
    h2 = jnp.dot(h1.astype(jnp.bfloat16), w2_ref[...],
                 preferred_element_type=jnp.float32) + b2_ref[...]
    h2 = jnp.maximum(h2, 0.0)

    # Output layer: Linear (padded columns get bias -1e9 -> never win the max,
    # exp(shifted) == 0 there, so logsumexp over real classes is exact).
    logits = jnp.dot(h2.astype(jnp.bfloat16), w3_ref[...],
                     preferred_element_type=jnp.float32) + b3_ref[...]

    # LogSoftmax over dim=1 (feature axis), numerically stable.
    m = jnp.max(logits, axis=-1, keepdims=True)
    shifted = logits - m
    lse = jnp.log(jnp.sum(jnp.exp(shifted), axis=-1, keepdims=True))
    out_ref[...] = shifted - lse


def pos_ffnn_forward(x, params, *, tile_b=512):
    """x: (B, d_in) float32. params: dict of (in,out) weights / (1,out) biases.

    tile_b: target batch tile (sweep 256-1024; multiple of 128 recommended).
    """
    B, d_in = x.shape
    w1, b1 = params["w1"], params["b1"]   # (d_in, h1), (1, h1)
    w2, b2 = params["w2"], params["b2"]   # (h1, h2),  (1, h2)
    w3, b3 = params["w3"], params["b3"]   # (h2, d_out), (1, d_out)
    h1_dim, h2_dim = w1.shape[1], w2.shape[1]
    d_out = w3.shape[1]

    # --- lane-dense padding of the feature dims -----------------------------
    d_in_p = _round_up(d_in, LANE)
    d_out_p = _round_up(d_out, LANE)

    w1p = (jnp.zeros((d_in_p, h1_dim), jnp.float32)
           .at[:d_in, :].set(w1.astype(jnp.float32))).astype(jnp.bfloat16)
    w2p = w2.astype(jnp.bfloat16)
    w3p = (jnp.zeros((h2_dim, d_out_p), jnp.float32)
           .at[:, :d_out].set(w3.astype(jnp.float32))).astype(jnp.bfloat16)
    b1p = b1.astype(jnp.float32)
    b2p = b2.astype(jnp.float32)
    # Padded logit columns pinned to -1e9 (not -inf, to avoid inf-inf NaNs).
    b3p = (jnp.full((1, d_out_p), -1e9, jnp.float32)
           .at[:, :d_out].set(b3.astype(jnp.float32)))

    # --- batch tiling (no divisibility requirement on B) ---------------------
    eff_tile_b = min(tile_b, _round_up(B, 8))
    eff_tile_b = _round_up(eff_tile_b, 8)
    B_p = _round_up(B, eff_tile_b)
    grid = (B_p // eff_tile_b,)

    xp = (jnp.zeros((B_p, d_in_p), jnp.float32)
          .at[:B, :d_in].set(x.astype(jnp.float32))).astype(jnp.bfloat16)

    full = lambda i: (0, 0)  # weights/biases: same (whole) block every step

    out = pl.pallas_call(
        ffnn_kernel,
        out_shape=jax.ShapeDtypeStruct((B_p, d_out_p), jnp.float32),
        grid_spec=pltpu.PrefetchScalarGridSpec(
            num_scalar_prefetch=0,
            grid=grid,
            in_specs=[
                pl.BlockSpec((eff_tile_b, d_in_p), lambda i: (i, 0)),  # x tile
                pl.BlockSpec(w1p.shape, full),
                pl.BlockSpec(b1p.shape, full),
                pl.BlockSpec(w2p.shape, full),
                pl.BlockSpec(b2p.shape, full),
                pl.BlockSpec(w3p.shape, full),
                pl.BlockSpec(b3p.shape, full),
            ],
            out_specs=pl.BlockSpec((eff_tile_b, d_out_p), lambda i: (i, 0)),
        ),
        compiler_params=pltpu.CompilerParams(
            dimension_semantics=("parallel",)),
    )(xp, w1p, b1p, w2p, b2p, w3p, b3p)

    # Drop batch padding and lane padding.
    return out[:B, :d_out]


def init_params(key, input_dim, hidden_layers, output_dim):
    """Deterministic synthetic init. Stored already transposed to (in, out)."""
    dims = [input_dim] + list(hidden_layers) + [output_dim]
    params = {}
    for i in range(len(dims) - 1):
        key, kw, kb = jax.random.split(key, 3)
        fan_in, fan_out = dims[i], dims[i + 1]
        bound = 1.0 / jnp.sqrt(fan_in)
        w = jax.random.uniform(kw, (fan_in, fan_out), jnp.float32, -bound, bound)
        b = jax.random.uniform(kb, (1, fan_out), jnp.float32, -bound, bound)
        params[f"w{i + 1}"] = w
        params[f"b{i + 1}"] = b
    return params


def reference_forward_bf16(x, params):
    """Matches kernel numerics: bf16 matmul operands, f32 accum/elementwise."""
    def mm(a, w):
        return jnp.dot(a.astype(jnp.bfloat16), w.astype(jnp.bfloat16),
                       preferred_element_type=jnp.float32)
    h1 = jnp.maximum(mm(x, params["w1"]) + params["b1"], 0.0)
    h2 = jnp.maximum(mm(h1, params["w2"]) + params["b2"], 0.0)
    logits = mm(h2, params["w3"]) + params["b3"]
    return jax.nn.log_softmax(logits, axis=1)


def reference_forward_f32(x, params):
    h1 = jnp.maximum(x @ params["w1"] + params["b1"], 0.0)
    h2 = jnp.maximum(h1 @ params["w2"] + params["b2"], 0.0)
    logits = h2 @ params["w3"] + params["b3"]
    return jax.nn.log_softmax(logits, axis=1)


if __name__ == "__main__":
    # Small shapes consistent with the module: hidden_layers = [128, 256].
    # B deliberately not a multiple of the tile to exercise batch padding.
    B, INPUT_DIM, OUTPUT_DIM = 10, 32, 16
    HIDDEN_LAYERS = [128, 256]

    key = jax.random.PRNGKey(0)
    key, kx = jax.random.split(key)
    x = jax.random.normal(kx, (B, INPUT_DIM), jnp.float32)
    params = init_params(key, INPUT_DIM, HIDDEN_LAYERS, OUTPUT_DIM)

    out = pos_ffnn_forward(x, params, tile_b=512)
    out = jax.block_until_ready(out)
    assert out.shape == (B, OUTPUT_DIM)

    # Tight-ish check against a reference that mirrors the kernel's bf16
    # matmul / f32 accumulation numerics.
    ref_bf16 = reference_forward_bf16(x, params)
    assert jnp.allclose(out, ref_bf16, atol=2e-2, rtol=2e-2), \
        "mismatch vs bf16-matched reference"

    # Loose semantic check against the pure-f32 reference (bf16 operands
    # introduce small numeric drift relative to f32 matmuls).
    ref_f32 = reference_forward_f32(x, params)
    assert jnp.allclose(out, ref_f32, atol=1e-1, rtol=1e-1), \
        "mismatch vs f32 reference"

    print("KERNEL_OK")
</pallas_src>

<mosaic_0001>
module attributes {stable_mosaic.version = 11 : i64} {
  func.func @ffnn_kernel(%arg0: i32, %arg1: memref<16x128xbf16, #tpu.memory_space<vmem>>, %arg2: memref<128x128xbf16, #tpu.memory_space<vmem>>, %arg3: memref<1x128xf32, #tpu.memory_space<vmem>>, %arg4: memref<128x256xbf16, #tpu.memory_space<vmem>>, %arg5: memref<1x256xf32, #tpu.memory_space<vmem>>, %arg6: memref<256x128xbf16, #tpu.memory_space<vmem>>, %arg7: memref<1x128xf32, #tpu.memory_space<vmem>>, %arg8: memref<16x128xf32, #tpu.memory_space<vmem>>) attributes {dimension_semantics = [#tpu.dimension_semantics<parallel>], iteration_bounds = array<i64: 1>, scalar_prefetch = 0 : i64, scratch_operands = 0 : i64, tpu.core_type = #tpu.core_type<tc>, window_params = [{transform_indices = @transform_0, window_bounds = array<i64: 16, 128>}, {pipeline_mode = #tpu.pipeline_mode<synchronous>, transform_indices = @transform_1, window_bounds = array<i64: 128, 128>}, {pipeline_mode = #tpu.pipeline_mode<synchronous>, transform_indices = @transform_2, window_bounds = array<i64: 1, 128>}, {pipeline_mode = #tpu.pipeline_mode<synchronous>, transform_indices = @transform_3, window_bounds = array<i64: 128, 256>}, {pipeline_mode = #tpu.pipeline_mode<synchronous>, transform_indices = @transform_4, window_bounds = array<i64: 1, 256>}, {pipeline_mode = #tpu.pipeline_mode<synchronous>, transform_indices = @transform_5, window_bounds = array<i64: 256, 128>}, {pipeline_mode = #tpu.pipeline_mode<synchronous>, transform_indices = @transform_6, window_bounds = array<i64: 1, 128>}, {transform_indices = @transform_7, window_bounds = array<i64: 16, 128>}]} {
    %c0 = arith.constant 0 : index
    %c0_0 = arith.constant 0 : index
    %0 = vector.load %arg1[%c0, %c0_0] : memref<16x128xbf16, #tpu.memory_space<vmem>>, vector<16x128xbf16>
    %c0_1 = arith.constant 0 : index
    %c0_2 = arith.constant 0 : index
    %1 = vector.load %arg2[%c0_1, %c0_2] : memref<128x128xbf16, #tpu.memory_space<vmem>>, vector<128x128xbf16>
    %cst = arith.constant dense<0.000000e+00> : vector<16x128xf32>
    %2 = tpu.matmul %0, %1, %cst {dimension_numbers = #tpu.dot_dimension_numbers<[1], [0], [0], [1], [0, 0, 1, 1], [], []>} : vector<16x128xbf16>, vector<128x128xbf16>, vector<16x128xf32> -> vector<16x128xf32>
    %c0_3 = arith.constant 0 : index
    %c0_4 = arith.constant 0 : index
    %3 = vector.load %arg3[%c0_3, %c0_4] : memref<1x128xf32, #tpu.memory_space<vmem>>, vector<1x128xf32>
    %4 = vector.broadcast %3 : vector<1x128xf32> to vector<16x128xf32>
    %5 = arith.addf %2, %4 : vector<16x128xf32>
    %cst_5 = arith.constant 0.000000e+00 : f32
    %6 = vector.broadcast %cst_5 : f32 to vector<16x128xf32>
    %7 = arith.maximumf %5, %6 : vector<16x128xf32>
    %8 = arith.truncf %7 : vector<16x128xf32> to vector<16x128xbf16>
    %c0_6 = arith.constant 0 : index
    %c0_7 = arith.constant 0 : index
    %9 = vector.load %arg4[%c0_6, %c0_7] : memref<128x256xbf16, #tpu.memory_space<vmem>>, vector<128x256xbf16>
    %cst_8 = arith.constant dense<0.000000e+00> : vector<16x256xf32>
    %10 = tpu.matmul %8, %9, %cst_8 {dimension_numbers = #tpu.dot_dimension_numbers<[1], [0], [0], [1], [0, 0, 1, 1], [], []>} : vector<16x128xbf16>, vector<128x256xbf16>, vector<16x256xf32> -> vector<16x256xf32>
    %c0_9 = arith.constant 0 : index
    %c0_10 = arith.constant 0 : index
    %11 = vector.load %arg5[%c0_9, %c0_10] : memref<1x256xf32, #tpu.memory_space<vmem>>, vector<1x256xf32>
    %12 = vector.broadcast %11 : vector<1x256xf32> to vector<16x256xf32>
    %13 = arith.addf %10, %12 : vector<16x256xf32>
    %cst_11 = arith.constant 0.000000e+00 : f32
    %14 = vector.broadcast %cst_11 : f32 to vector<16x256xf32>
    %15 = arith.maximumf %13, %14 : vector<16x256xf32>
    %16 = arith.truncf %15 : vector<16x256xf32> to vector<16x256xbf16>
    %c0_12 = arith.constant 0 : index
    %c0_13 = arith.constant 0 : index
    %17 = vector.load %arg6[%c0_12, %c0_13] : memref<256x128xbf16, #tpu.memory_space<vmem>>, vector<256x128xbf16>
    %cst_14 = arith.constant dense<0.000000e+00> : vector<16x128xf32>
    %18 = tpu.matmul %16, %17, %cst_14 {dimension_numbers = #tpu.dot_dimension_numbers<[1], [0], [0], [1], [0, 0, 1, 1], [], []>} : vector<16x256xbf16>, vector<256x128xbf16>, vector<16x128xf32> -> vector<16x128xf32>
    %c0_15 = arith.constant 0 : index
    %c0_16 = arith.constant 0 : index
    %19 = vector.load %arg7[%c0_15, %c0_16] : memref<1x128xf32, #tpu.memory_space<vmem>>, vector<1x128xf32>
    %20 = vector.broadcast %19 : vector<1x128xf32> to vector<16x128xf32>
    %21 = arith.addf %18, %20 : vector<16x128xf32>
    %cst_17 = arith.constant dense<0xFF800000> : vector<16xf32>
    %22 = vector.multi_reduction <maximumf>, %21, %cst_17 [1] : vector<16x128xf32> to vector<16xf32>
    %23 = vector.shape_cast %22 : vector<16xf32> to vector<16x1xf32>
    %24 = vector.broadcast %23 : vector<16x1xf32> to vector<16x128xf32>
    %25 = arith.subf %21, %24 : vector<16x128xf32>
    %26 = math.exp %25 : vector<16x128xf32>
    %cst_18 = arith.constant dense<0.000000e+00> : vector<16xf32>
    %27 = vector.multi_reduction <add>, %26, %cst_18 [1] : vector<16x128xf32> to vector<16xf32>
    %28 = vector.shape_cast %27 : vector<16xf32> to vector<16x1xf32>
    %29 = math.log %28 : vector<16x1xf32>
    %30 = vector.broadcast %29 : vector<16x1xf32> to vector<16x128xf32>
    %31 = arith.subf %25, %30 : vector<16x128xf32>
    %c0_19 = arith.constant 0 : index
    %c0_20 = arith.constant 0 : index
    %32 = vector.load %arg8[%c0_19, %c0_20] : memref<16x128xf32, #tpu.memory_space<vmem>>, vector<16x128xf32>
    tpu.vector_store %arg8[%c0_19, %c0_20], %31 {strides = array<i32>} : memref<16x128xf32, #tpu.memory_space<vmem>>, vector<16x128xf32>,
    return
  }
  func.func @transform_0(%arg0: i32) -> (i32, i32) {
    %c0_i32 = arith.constant 0 : i32
    %c0_i32_0 = arith.constant 0 : i32
    return %arg0, %c0_i32 : i32, i32
  }
  func.func @transform_1(%arg0: i32) -> (i32, i32) {
    %c0_i32 = arith.constant 0 : i32
    %c0_i32_0 = arith.constant 0 : i32
    %c0_i32_1 = arith.constant 0 : i32
    return %c0_i32, %c0_i32_0 : i32, i32
  }
  func.func @transform_2(%arg0: i32) -> (i32, i32) {
    %c0_i32 = arith.constant 0 : i32
    %c0_i32_0 = arith.constant 0 : i32
    %c0_i32_1 = arith.constant 0 : i32
    return %c0_i32, %c0_i32_0 : i32, i32
  }
  func.func @transform_3(%arg0: i32) -> (i32, i32) {
    %c0_i32 = arith.constant 0 : i32
    %c0_i32_0 = arith.constant 0 : i32
    %c0_i32_1 = arith.constant 0 : i32
    return %c0_i32, %c0_i32_0 : i32, i32
  }
  func.func @transform_4(%arg0: i32) -> (i32, i32) {
    %c0_i32 = arith.constant 0 : i32
    %c0_i32_0 = arith.constant 0 : i32
    %c0_i32_1 = arith.constant 0 : i32
    return %c0_i32, %c0_i32_0 : i32, i32
  }
  func.func @transform_5(%arg0: i32) -> (i32, i32) {
    %c0_i32 = arith.constant 0 : i32
    %c0_i32_0 = arith.constant 0 : i32
    %c0_i32_1 = arith.constant 0 : i32
    return %c0_i32, %c0_i32_0 : i32, i32
  }
  func.func @transform_6(%arg0: i32) -> (i32, i32) {
    %c0_i32 = arith.constant 0 : i32
    %c0_i32_0 = arith.constant 0 : i32
    %c0_i32_1 = arith.constant 0 : i32
    return %c0_i32, %c0_i32_0 : i32, i32
  }
  func.func @transform_7(%arg0: i32) -> (i32, i32) {
    %c0_i32 = arith.constant 0 : i32
    %c0_i32_0 = arith.constant 0 : i32
    return %arg0, %c0_i32 : i32, i32
  }
}

</mosaic_0001>

<bundles_post_ra>
// kernel: tpu_custom_call.1
= control target key start
LH: loop header
LB: loop body
LE: loop exit
PB: predicated region body
PF: predicated region fallthrough
CT: control target
= control target key end

     0   :  { %12 = vsyncpa [#allocation3], 0  ;;  %s942_s0 = inlined_call_operand.hbm [shape: bf16[16,128], index: 0, kind: input, shape index: {}]   ;;  %s943_s1 = inlined_call_operand.hbm [shape: bf16[128,128], index: 1, kind: input, shape index: {}]   ;;  %s944_s2 = inlined_call_operand.vmem [shape: f32[1,128], index: 2, kind: input, shape index: {}]   ;;  %s945_s3 = inlined_call_operand.hbm [shape: bf16[128,256], index: 3, kind: input, shape index: {}]   ;;  %s946_s4 = inlined_call_operand.vmem [shape: f32[1,256], index: 4, kind: input, shape index: {}]   ;;  %s947_s5 = inlined_call_operand.hbm [shape: bf16[256,128], index: 5, kind: input, shape index: {}]   ;;  %s948_s6 = inlined_call_operand.vmem [shape: f32[1,128], index: 6, kind: input, shape index: {}]   ;;  %s949_s7 = inlined_call_operand.hbm [shape: f32[16,128], index: 7, kind: output, shape index: {}]  }
   0x1   :  { %13 = vsyncpa [#allocation6], 0 }
   0x2   :  { %14 = vsyncpa [#allocation9], 0 }
   0x3   :  { %15 = vsyncpa [#allocation4], 0  ;;  %s851_s24 = smov [#allocation5]   ;;  %s852_s26 = smov [#allocation2]  }
   0x4   :  { %s33_s25 = sshll.u32 %s851_s24, 4  ;;  %s21_s27 = sshll.u32 %s852_s26, 4  ;;  %s34_s25 = int_to_ptr.vmem [resolvable:$true] %s33_s25  ;;  %s22_s27 = int_to_ptr.vmem [resolvable:$true] %s21_s27 }
   0x5   :  { %s751_s28 = scalar_lea.vmem %s34_s25, 1024  ;;  %p756_p1 = scmp.lt.s32.totalorder %s34_s25, %s34_s25 }
   0x6   :  { %p752_p0 = scmp.ne.s32.totalorder %s34_s25, %s751_s28  ;;  %p757_p2 = scmp.lt.s32.totalorder %s751_s28, %s751_s28 }
   0x8   :  { %p758_p3 = por %p757_p2, %p756_p1 }
   0xa   :  { %p759_p4 = pnand %p758_p3, %p752_p0 }
   0xc   :  { %762 = shalt.err (!%p759_p4)
}
   0xd   :  { %s853_s29 = smov 64   ;;  %s854_s30 = smov 4  }
   0xe   :  { %39 = dma.hbm_to_vmem [thread:$0]  %s943_s1, 1024, %s34_s25, [#allocation6], %s853_s29, %s853_s29, %s854_s30  }
   0xf   :  { %s771_s10 = scalar_lea.vmem %s22_s27, 128  ;;  %p776_p6 = scmp.lt.s32.totalorder %s22_s27, %s22_s27 }
  0x10   :  { %p772_p5 = scmp.ne.s32.totalorder %s22_s27, %s771_s10  ;;  %p777_p7 = scmp.lt.s32.totalorder %s771_s10, %s771_s10 }
  0x12   :  { %p778_p8 = por %p777_p7, %p776_p6 }
  0x14   :  { %p779_p9 = pnand %p778_p8, %p772_p5 }
  0x16   :  { %782 = shalt.err (!%p779_p9)
}
  0x17   :  { %27 = dma.hbm_to_vmem [thread:$0]  %s942_s0, 128, %s22_s27, [#allocation3], %s853_s29, %s853_s29, %s854_s30  }
  0x18   :  { %s855_s13 = smov [#allocation7]  }
  0x19   :  { %s47_s14 = sshll.u32 %s855_s13, 4  ;;  %s48_s14 = int_to_ptr.vmem [resolvable:$true] %s47_s14 }
  0x1a   :  { %s791_s15 = scalar_lea.vmem %s48_s14, 2048  ;;  %p796_p11 = scmp.lt.s32.totalorder %s48_s14, %s48_s14 }
  0x1b   :  { %p792_p10 = scmp.ne.s32.totalorder %s48_s14, %s791_s15  ;;  %p797_p12 = scmp.lt.s32.totalorder %s791_s15, %s791_s15 }
  0x1d   :  { %p798_p13 = por %p797_p12, %p796_p11 }
  0x1f   :  { %p799_p0 = pnand %p798_p13, %p792_p10 }
  0x21   :  { %802 = shalt.err (!%p799_p0)
}
  0x22   :  { %s856_s1 = smov 128   ;;  %s857_s16 = smov 8  }
  0x23   :  { %53 = dma.hbm_to_vmem [thread:$0]  %s945_s3, 2048, %s48_s14, [#allocation6], %s856_s1, %s856_s1, %s857_s16  }
  0x24   :  { %s858_s0 = smov [#allocation8]  }
  0x25   :  { %s61_s19 = sshll.u32 %s858_s0, 4  ;;  %s62_s19 = int_to_ptr.vmem [resolvable:$true] %s61_s19 }
  0x26   :  { %s811_s20 = scalar_lea.vmem %s62_s19, 2048  ;;  %p816_p2 = scmp.lt.s32.totalorder %s62_s19, %s62_s19 }
  0x27   :  { %p812_p1 = scmp.ne.s32.totalorder %s62_s19, %s811_s20  ;;  %p817_p3 = scmp.lt.s32.totalorder %s811_s20, %s811_s20 }
  0x29   :  { %p818_p4 = por %p817_p3, %p816_p2 }
  0x2b   :  { %p819_p5 = pnand %p818_p4, %p812_p1 }
  0x2d   :  { %822 = shalt.err (!%p819_p5)
}
  0x2e   :  { %67 = dma.hbm_to_vmem [thread:$0]  %s947_s5, 2048, %s62_s19, [#allocation9], %s853_s29, %s853_s29, %s854_s30  }
  0x2f   :  { %843 = dma.done.wait [#allocation3], 128  }
  0x30   :  { %844 = vsyncadd [#allocation3], 4294967168 }
  0x31   :  { %845 = dma.done.wait [#allocation6], 3072  }
  0x32   :  { %846 = vsyncadd [#allocation6], 4294964224 }
  0x33   :  { %847 = dma.done.wait [#allocation9], 2048  }
  0x34   :  { %848 = vsyncadd [#allocation9], 4294965248  ;;  %v859_v0 = vmov 0.0   ;;  %vm860_vm0 = vmmov 0   ;;  %v686_v1 = vld [vmem:[#allocation5 + $0x38] sm:$0xff]   ;;  %v687_v2 = vld [vmem:[#allocation5 + $0x30] sm:$0xff]   ;;  %v224_v53 = vlaneseq }
  0x35   :  { %654 = vmatprep.subr.bf16.mxu0 %v859_v0  ;;  %670 = vmatprep.mubr.msk.bf16.mxu0 %vm860_vm0, %v859_v0  ;;  %v688_v3 = vld [vmem:[#allocation5 + $0x28] sm:$0xff]   ;;  %v689_v4 = vld [vmem:[#allocation5 + $0x20] sm:$0xff]   ;;  %v695_v5 = vld [vmem:[#allocation7 + $0x74] ss:$8 sps:$4 sm:$0xff]   ;;  %v861_v26 = vmov 0  }
  0x36   :  { %655 = vmatpush3.bf16.msra.mxu0 %v686_v1  ;;  %v697_v6 = vld [vmem:[#allocation7 + $0x70] ss:$8 sps:$4 sm:$0xff]   ;;  %314 = vmatprep.subr.bf16.mxu1 %v695_v5  ;;  %v698_v7 = vld [vmem:[#allocation7 + $0x64] ss:$8 sps:$4 sm:$0xff]   ;;  %v700_v8 = vld [vmem:[#allocation7 + $0x60] ss:$8 sps:$4 sm:$0xff]  }
  0x37   :  { %656 = vmatprep.subr.bf16.mxu0 %v859_v0  ;;  %315 = vmatpush1.bf16.msra.mxu1 %v697_v6  ;;  %v701_v9 = vld [vmem:[#allocation7 + $0x54] ss:$8 sps:$4 sm:$0xff]   ;;  %v703_v12 = vld [vmem:[#allocation7 + $0x50] ss:$8 sps:$4 sm:$0xff]   ;;  %v704_v13 = vld [vmem:[#allocation7 + $0x44] ss:$8 sps:$4 sm:$0xff]  }
  0x38   :  { %316 = vmatprep.subr.bf16.mxu1 %v698_v7  ;;  %v690_v10 = vld [vmem:[#allocation5 + $0x18] sm:$0xff]   ;;  %v691_v11 = vld [vmem:[#allocation5 + $0x10] sm:$0xff]   ;;  %v706_v14 = vld [vmem:[#allocation7 + $0x40] ss:$8 sps:$4 sm:$0xff]   ;;  %346 = vmatprep.mubr.bf16.mxu1 %v861_v26  ;;  %v225_v54 = vshrl.u32 %v224_v53, 7 }
  0x39   :  { %v707_v15 = vld [vmem:[#allocation7 + $0x34] ss:$8 sps:$4 sm:$0xff]   ;;  %v692_v16 = vld [vmem:[#allocation5 + $0x8] sm:$0xff]   ;;  %v709_v17 = vld [vmem:[#allocation7 + $0x30] ss:$8 sps:$4 sm:$0xff]  }
  0x3a   :  { %657 = vmatpush3.bf16.msra.mxu0 %v687_v2  ;;  %v710_v18 = vld [vmem:[#allocation7 + $0x24] ss:$8 sps:$4 sm:$0xff]   ;;  %v694_v20 = vld [vmem:[#allocation2] sm:$0xff]   ;;  %v712_v21 = vld [vmem:[#allocation7 + $0x20] ss:$8 sps:$4 sm:$0xff]   ;;  %v230_v55 = vsub.s32 1, %v225_v54 }
  0x3b   :  { %658 = vmatprep.subr.bf16.mxu0 %v859_v0  ;;  %317 = vmatpush1.bf16.msra.mxu1 %v700_v8  ;;  %v693_v19 = vld [vmem:[#allocation5] sm:$0xff]   ;;  %v713_v22 = vld [vmem:[#allocation7 + $0x14] ss:$8 sps:$4 sm:$0xff]   ;;  %v715_v23 = vld [vmem:[#allocation7 + $0x10] ss:$8 sps:$4 sm:$0xff]   ;;  %v226_v56 = vsub.s32 0, %v225_v54 }
  0x3c   :  { %318 = vmatprep.subr.bf16.mxu1 %v701_v9  ;;  %v716_v24 = vld [vmem:[#allocation7 + $0x4] ss:$8 sps:$4 sm:$0xff]   ;;  %v718_v25 = vld [vmem:[#allocation7] ss:$8 sps:$4 sm:$0xff]   ;;  %v719_v27 = vld [vmem:[#allocation8 + $0x78] sm:$0xff]  }
  0x3d   :  { %v720_v28 = vld [vmem:[#allocation8 + $0x38] sm:$0xff]   ;;  %v721_v29 = vld [vmem:[#allocation8 + $0x70] sm:$0xff]   ;;  %v723_v31 = vld [vmem:[#allocation8 + $0x68] sm:$0xff]  }
  0x3e   :  { %659 = vmatpush3.bf16.msra.mxu0 %v688_v3  ;;  %v722_v30 = vld [vmem:[#allocation8 + $0x30] sm:$0xff]   ;;  %v724_v32 = vld [vmem:[#allocation8 + $0x28] sm:$0xff]   ;;  %v725_v33 = vld [vmem:[#allocation8 + $0x60] sm:$0xff]  }
  0x3f   :  { %660 = vmatprep.subr.bf16.mxu0 %v859_v0  ;;  %319 = vmatpush1.bf16.msra.mxu1 %v703_v12  ;;  %v726_v34 = vld [vmem:[#allocation8 + $0x20] sm:$0xff]   ;;  %v727_v35 = vld [vmem:[#allocation8 + $0x58] sm:$0xff]   ;;  %v729_v47 = vld [vmem:[#allocation8 + $0x50] sm:$0xff]  }
  0x40   :  { %320 = vmatprep.subr.bf16.mxu1 %v704_v13  ;;  %v728_v36 = vld [vmem:[#allocation8 + $0x18] sm:$0xff]   ;;  %v730_v48 = vld [vmem:[#allocation8 + $0x10] sm:$0xff]   ;;  %v731_v49 = vld [vmem:[#allocation8 + $0x48] sm:$0xff]  }
  0x41   :  { %v580_v37 = vld [vmem:[%s944_s2] ss:$0 sm:$0xff]  ;;  %v732_v50 = vld [vmem:[#allocation8 + $0x8] sm:$0xff]   ;;  %v733_v51 = vld [vmem:[#allocation8 + $0x40] sm:$0xff]  }
  0x42   :  { %661 = vmatpush3.bf16.msra.mxu0 %v689_v4  ;;  %v734_v52 = vld [vmem:[#allocation8] sm:$0xff]   ;;  %v222_v57 = vld [vmem:[%s946_s4] sm:$0x3] }
  0x43   :  { %662 = vmatprep.subr.bf16.mxu0 %v859_v0  ;;  %321 = vmatpush1.bf16.msra.mxu1 %v706_v14  ;;  %v231_v59 = vrot.slane %v222_v57, %v230_v55  ;;  %v227_v60 = vrot.slane %v222_v57, %v226_v56  ;;  %v606_v12 = vld [vmem:[%s948_s6] ss:$0 sm:$0xff]  ;;  %s862_s6 = smov [#allocation10]  }
  0x44   :  { %322 = vmatprep.subr.bf16.mxu1 %v707_v15  ;;  %s566_s25 = sshll.u32 %s862_s6, 4  ;;  %s567_s25 = int_to_ptr.vmem [resolvable:$true] %s566_s25 }
  0x45   :  { %s823_s26 = scalar_lea.vmem %s567_s25, 256  ;;  %p828_p7 = scmp.lt.s32.totalorder %s567_s25, %s567_s25 }
  0x46   :  { %663 = vmatpush3.bf16.msra.mxu0 %v690_v10  ;;  %p824_p6 = scmp.ne.s32.totalorder %s567_s25, %s823_s26  ;;  %p829_p8 = scmp.lt.s32.totalorder %s823_s26, %s823_s26 }
  0x47   :  { %664 = vmatprep.subr.bf16.mxu0 %v859_v0  ;;  %323 = vmatpush1.bf16.msra.mxu1 %v709_v17 }
  0x48   :  { %324 = vmatprep.subr.bf16.mxu1 %v710_v18  ;;  %p830_p9 = por %p829_p8, %p828_p7 }
  0x4a   :  { %665 = vmatpush3.bf16.msra.mxu0 %v691_v11  ;;  %p831_p10 = pnand %p830_p9, %p824_p6 }
  0x4b   :  { %666 = vmatprep.subr.bf16.mxu0 %v859_v0  ;;  %325 = vmatpush1.bf16.msra.mxu1 %v712_v21 }
  0x4c   :  { %326 = vmatprep.subr.bf16.mxu1 %v713_v22 }
  0x4e   :  { %667 = vmatpush3.bf16.msra.mxu0 %v692_v16 }
  0x4f   :  { %668 = vmatprep.subr.bf16.mxu0 %v859_v0  ;;  %327 = vmatpush1.bf16.msra.mxu1 %v715_v23 }
  0x50   :  { %328 = vmatprep.subr.bf16.mxu1 %v716_v24 }
  0x52   :  { %669 = vmatpush3.bf16.msra.mxu0 %v693_v19 }
  0x53   :  { %329 = vmatpush1.bf16.msra.mxu1 %v718_v25  ;;  %632 = vmatprep.subr.bf16.mxu0 %v719_v27 }
  0x55   :  { %671 = vmatmul.mubr.bf16.vlgmr.msra.gmra.mxu0 %v694_v20 }
  0x56   :  { %633 = vmatpush3.bf16.msra.mxu0 %v720_v28 }
  0x57   :  { %634 = vmatprep.subr.bf16.mxu0 %v721_v29 }
  0x5a   :  { %635 = vmatpush3.bf16.msra.mxu0 %v722_v30 }
  0x5b   :  { %636 = vmatprep.subr.bf16.mxu0 %v723_v31 }
  0x5e   :  { %637 = vmatpush3.bf16.msra.mxu0 %v724_v32 }
  0x5f   :  { %638 = vmatprep.subr.bf16.mxu0 %v725_v33 }
  0x62   :  { %639 = vmatpush3.bf16.msra.mxu0 %v726_v34 }
  0x63   :  { %640 = vmatprep.subr.bf16.mxu0 %v727_v35 }
  0x66   :  { %641 = vmatpush3.bf16.msra.mxu0 %v728_v36 }
  0x67   :  { %642 = vmatprep.subr.bf16.mxu0 %v729_v47 }
  0x6a   :  { %643 = vmatpush3.bf16.msra.mxu0 %v730_v48 }
  0x6b   :  { %644 = vmatprep.subr.bf16.mxu0 %v731_v49 }
  0x6e   :  { %645 = vmatpush3.bf16.msra.mxu0 %v732_v50 }
  0x6f   :  { %646 = vmatprep.subr.bf16.mxu0 %v733_v51 }
  0x72   :  { %647 = vmatpush3.bf16.msra.mxu0 %v734_v52 }
 0x115   :  { %v196_v38 = vpop.f32.mrf.mxu0 }
 0x116   :  { %v197_v40 = vadd.f32 %v580_v37, %v196_v38 }
 0x117   :  { %v672_v39 = vpop.f32.mrf.mxu0 }
 0x118   :  { %v203_v44 = vmax.f32 %v197_v40, 0.0 }
 0x119   :  { %v199_v41 = vpop.f32.mrf.mxu0 }
 0x11a   :  { %v200_v42 = vadd.f32 %v580_v37, %v199_v41 }
 0x11b   :  { %v673_v43 = vpop.f32.mrf.mxu0 }
 0x11c   :  { %v204_v45 = vmax.f32 %v200_v42, 0.0 }
 0x11e   :  { %v205_v46 = vpack.c.bf16 %v204_v45, %v203_v44 }
 0x120   :  { %347 = vmatmul.mubr.bf16.vlgmr.msra.gmra.mxu1 %v205_v46 }
 0x1e0   :  { %v348_v58 = vpop.f32.mrf.mxu1 }
 0x1e1   :  { %v349_v1 = vadd.f32 %v348_v58, %v227_v60 }
 0x1e2   :  { %v350_v61 = vpop.f32.mrf.mxu1 }
 0x1e3   :  { %v351_v63 = vadd.f32 %v350_v61, %v231_v59  ;;  %v357_v7 = vmax.f32 %v349_v1, 0.0 }
 0x1e4   :  { %v352_v62 = vpop.f32.mrf.mxu1 }
 0x1e5   :  { %v353_v0 = vadd.f32 %v352_v62, %v227_v60  ;;  %v358_v5 = vmax.f32 %v351_v63, 0.0 }
 0x1e6   :  { %v354_v2 = vpop.f32.mrf.mxu1 }
 0x1e7   :  { %v355_v3 = vadd.f32 %v354_v2, %v231_v59  ;;  %v359_v4 = vmax.f32 %v353_v0, 0.0 }
 0x1e9   :  { %v360_v6 = vmax.f32 %v355_v3, 0.0  ;;  %v361_v9 = vpack.c.bf16 %v359_v4, %v357_v7 }
 0x1eb   :  { %v362_v8 = vpack.c.bf16 %v360_v6, %v358_v5 }
 0x1ed   :  { %530 = vmatprep.mubr.bf16.mxu0 %v362_v8 }
 0x1ee   :  { %531 = vmatmul.mubr.bf16.vlgmr.msra.gmra.mxu0 %v361_v9 }
 0x2ae   :  { %v648_v10 = vpop.f32.mrf.mxu0 }
 0x2b0   :  { %v649_v11 = vpop.f32.mrf.mxu0 }
 0x2b1   :  { %v650_v13 = vadd.f32 %v649_v11, %v648_v10 }
 0x2b2   :  { %v651_v14 = vpop.f32.mrf.mxu0 }
 0x2b3   :  { %v533_v15 = vadd.f32 %v650_v13, %v606_v12 }
 0x2b4   :  { %v652_v16 = vpop.f32.mrf.mxu0 }
 0x2b5   :  { %v653_v17 = vadd.f32 %v652_v16, %v651_v14  ;;  %539 = vmax.xlane.f32.xlu0 %v533_v15 }
 0x2b7   :  { %v536_v18 = vadd.f32 %v653_v17, %v606_v12 }
 0x2b9   :  { %541 = vmax.xlane.f32.xlu0 %v536_v18 }
 0x33e   :  { %v540_v19 = vpop.xlane.xlu0 %539 }
 0x33f   :  { %v543_v20 = vsub.f32 %v533_v15, %v540_v19 }
 0x341   :  { %v545_v21 = vmul.f32 1.442695, %v543_v20 }
 0x342   :  { %v542_v22 = vpop.xlane.xlu0 %541 }
 0x343   :  { %v544_v23 = vsub.f32 %v536_v18, %v542_v22  ;;  %735 = vpow2.f32 %v545_v21 }
 0x345   :  { %v547_v24 = vmul.f32 1.442695, %v544_v23 }
 0x347   :  { %737 = vpow2.f32 %v547_v24 }
 0x350   :  { %v736_v25 = vpop.eup %735 }
 0x351   :  { %549 = vadd.xlane.f32.xlu1 %v736_v25 }
 0x354   :  { %v738_v26 = vpop.eup %737 }
 0x355   :  { %551 = vadd.xlane.f32.xlu1 %v738_v26 }
 0x3da   :  { %v550_v27 = vpop.xlane.xlu1 %549 }
 0x3db   :  { %739 = vlog2.f32 %v550_v27 }
 0x3de   :  { %v552_v28 = vpop.xlane.xlu1 %551 }
 0x3df   :  { %741 = vlog2.f32 %v552_v28 }
 0x3e8   :  { %v740_v29 = vpop.eup %739 }
 0x3e9   :  { %v554_v30 = vmul.f32 0.6931472, %v740_v29 }
 0x3eb   :  { %v557_v31 = vsub.f32 %v543_v20, %v554_v30 }
 0x3ec   :  { %v742_v32 = vpop.eup %741 }
 0x3ed   :  { %v556_v33 = vmul.f32 0.6931472, %v742_v32  ;;  %559 = vst [vmem:[#allocation10] sm:$0xff] %v557_v31 }
 0x3ef   :  { %v558_v34 = vsub.f32 %v544_v23, %v556_v33 }
 0x3f1   :  { %560 = vst [vmem:[#allocation10 + $0x8] sm:$0xff] %v558_v34 }
 0x3f2   :  { %834 = shalt.err (!%p831_p10)
}
 0x3f3   :  { %572 = dma.vmem_to_hbm [thread:$0]  %s567_s25, 256, %s949_s7, [#allocation4], %s856_s1, %s856_s1, %s857_s16  }
 0x3f4   :  { %849 = dma.done.wait [#allocation4], 256  }
 0x3f5   :  { %850 = vsyncadd [#allocation4], 4294967040 }
 0x3f6   :  { %576 = vsyncpa [#allocation3], 1 }
 0x3f7   :  { %577 = vsyncpa [#allocation6], 1 }
 0x3f8   :  { %578 = vsyncpa [#allocation9], 1 }
 0x3f9   :  { %579 = vsyncpa [#allocation4], 1 }

</bundles_post_ra>
